<compile_context>
chip_gen: v7x
topology: tpu7x:2x2x1
jax: 0.10.0
libtpu: 0.0.40
codegen_flags: <defaults>
</compile_context>

<pallas_src>
import math

import jax
import jax.numpy as jnp
from jax.experimental import pallas as pl
from jax.experimental.pallas import tpu as pltpu


def _upsample_conv1x1_kernel(x_ref, w_ref, b_ref, r_ref, o_ref):
    # x_ref : (1, Cin, Th*W)          native dtype, lane-dense (spatial flattened)
    # w_ref : (Cout, Cin)             VMEM, native dtype
    # b_ref : (Cout, 1)               VMEM, f32
    # r_ref : (Th*W, Th*W*s*s)        VMEM, 0/1 fused replication matrix (resident)
    # o_ref : (1, Cout, Th*W*s*s)     native dtype, lane-dense
    x = x_ref[0]                                                       # (Cin, ThW)

    # 1x1 conv (commuted before the upsample): one batched MXU matmul, f32 acc.
    acc = jnp.dot(w_ref[...], x, preferred_element_type=jnp.float32)  # (Cout, ThW)
    acc = acc + b_ref[...]                                             # bias bcast

    # Fused H+W nearest-neighbor expansion via a single 0/1 selection matmul,
    # producing one lane-dense tile -> one unmasked store.
    out = jnp.dot(acc.astype(r_ref.dtype), r_ref[...],
                  preferred_element_type=jnp.float32)                  # (Cout, ThsWo)
    o_ref[0] = out.astype(o_ref.dtype)


def _tile_footprint_bytes(th, W, s, Cin, Cout, in_isz, out_isz, r_isz):
    thw = th * W
    thswo = thw * s * s
    in_tile = Cin * thw * in_isz
    out_tile = Cout * thswo * out_isz
    resident = thw * thswo * r_isz + Cout * Cin * in_isz + Cout * 4
    # 2x: BlockSpec double-buffers the streamed input/output tiles.
    return 2 * (in_tile + out_tile) + resident


def _pick_row_tile(N, Cin, Cout, H, W, s, in_isz, out_isz, r_isz, budget_bytes):
    """Largest input-row tile Th with (Th*W % 128 == 0), H % Th == 0, footprint
    within budget, and enough grid steps for pipelining / megacore."""
    base = 128 // math.gcd(W, 128)          # smallest Th making Th*W lane-aligned
    cands = [t for t in range(base, H + 1, base) if H % t == 0]
    if not cands:
        # Irregular H: one full-height block (full-dim block sidesteps alignment).
        return H, _tile_footprint_bytes(H, W, s, Cin, Cout, in_isz, out_isz, r_isz)
    min_steps = max(2, min(4, N * (H // cands[0])))
    best = cands[0]
    for t in cands:
        fp = _tile_footprint_bytes(t, W, s, Cin, Cout, in_isz, out_isz, r_isz)
        if fp <= budget_bytes and N * (H // t) >= min_steps and t * W <= 2048:
            best = t
    return best, _tile_footprint_bytes(best, W, s, Cin, Cout, in_isz, out_isz, r_isz)


def upsample2d_nearest_conv1x1(x_nchw, weight, bias, scale):
    """UpSample2d forward (NEAREST_NEIGHBOR + 1x1 conv), NCHW in / NCHW out.

    x_nchw : (N, Cin, H, W)
    weight : (Cout, Cin, 1, 1)   (PyTorch Conv2d weight)
    bias   : (Cout,)
    """
    s = int(scale)
    if s != scale or s < 1:
        raise ValueError("only integer scale_factor >= 1 is supported (nearest mode)")
    if weight.shape[2:] != (1, 1):
        raise ValueError("only kernel_size=1 (module default) is supported")

    N, Cin, H, W = x_nchw.shape
    Cout = weight.shape[0]
    Ho, Wo = H * s, W * s

    x_dtype = x_nchw.dtype
    # 0/1 selectors: bf16 is exact; keep f32 when activations are f32 so the
    # intermediate conv result is never rounded.
    r_dtype = jnp.bfloat16 if x_dtype == jnp.bfloat16 else jnp.float32
    in_isz = jnp.dtype(x_dtype).itemsize
    out_isz = in_isz
    r_isz = jnp.dtype(r_dtype).itemsize

    # VMEM budget: query the chip, leave headroom for the pipeline's own scratch.
    phys_vmem = 64 * 1024 * 1024
    try:
        phys_vmem = int(getattr(pltpu.get_tpu_info(), "vmem_capacity_bytes", phys_vmem))
    except Exception:
        pass
    vmem_limit = int(min(0.75 * phys_vmem, 100 * 1024 * 1024))
    tile_budget = int(0.8 * vmem_limit)

    Th, footprint = _pick_row_tile(N, Cin, Cout, H, W, s,
                                   in_isz, out_isz, r_isz, tile_budget)
    ThW = Th * W
    ThsWo = ThW * s * s
    vmem_limit = int(min(max(vmem_limit, footprint + (4 << 20)), phys_vmem))

    # Flatten spatial dims (contiguous -> free layout plumbing); kernel works on
    # lane-dense (C, flat-spatial) tiles.
    x_flat = x_nchw.reshape(N, Cin, H * W)
    w2d = weight.reshape(Cout, Cin).astype(x_dtype)          # VMEM matmul operand
    b2d = bias.reshape(Cout, 1).astype(jnp.float32)

    # Fused 0/1 replication matrix: output flat index q (within a tile) selects
    # input flat index (q//Wo//s)*W + (q%Wo)//s.
    q = jnp.arange(ThsWo)
    src = ((q // Wo) // s) * W + (q % Wo) // s
    r_mat = (jnp.arange(ThW)[:, None] == src[None, :]).astype(r_dtype)

    conv_flops = 2 * N * Cout * Cin * H * W
    expand_flops = 2 * N * (H // Th) * Cout * ThW * ThsWo
    bytes_accessed = (x_flat.size * in_isz + w2d.size * in_isz + b2d.size * 4
                      + r_mat.size * r_isz + N * Cout * Ho * Wo * out_isz)

    out_flat = pl.pallas_call(
        _upsample_conv1x1_kernel,
        out_shape=jax.ShapeDtypeStruct((N, Cout, Ho * Wo), x_dtype),
        grid_spec=pltpu.PrefetchScalarGridSpec(
            num_scalar_prefetch=0,
            grid=(N, H // Th),
            in_specs=[
                pl.BlockSpec((1, Cin, ThW), lambda n, h: (n, 0, h)),   # activations
                pl.BlockSpec((Cout, Cin), lambda n, h: (0, 0)),        # weights
                pl.BlockSpec((Cout, 1), lambda n, h: (0, 0)),          # bias
                pl.BlockSpec((ThW, ThsWo), lambda n, h: (0, 0)),       # fused R
            ],
            out_specs=pl.BlockSpec((1, Cout, ThsWo), lambda n, h: (n, 0, h)),
        ),
        compiler_params=pltpu.CompilerParams(
            dimension_semantics=("parallel", "parallel"),
            vmem_limit_bytes=vmem_limit,
        ),
        cost_estimate=pl.CostEstimate(
            flops=int(conv_flops + expand_flops),
            transcendentals=0,
            bytes_accessed=int(bytes_accessed),
        ),
    )(x_flat, w2d, b2d, r_mat)

    return out_flat.reshape(N, Cout, Ho, Wo)


if __name__ == "__main__":
    N, Cin, Cout, H, W, scale = 2, 4, 8, 16, 16, 2

    key = jax.random.PRNGKey(0)
    kx, kw, kb = jax.random.split(key, 3)
    x = jax.random.normal(kx, (N, Cin, H, W), dtype=jnp.float32)
    # Deterministic synthetic parameters (shapes match nn.Conv2d(Cin, Cout, 1))
    weight = jax.random.normal(kw, (Cout, Cin, 1, 1), dtype=jnp.float32) * 0.1
    bias = jax.random.normal(kb, (Cout,), dtype=jnp.float32) * 0.1

    out = upsample2d_nearest_conv1x1(x, weight, bias, scale)
    out = jax.block_until_ready(out)

    # Pure-JAX reference (NCHW, same semantics as the PyTorch module)
    up_ref = jnp.repeat(jnp.repeat(x, scale, axis=2), scale, axis=3)
    ref = jnp.einsum("nchw,oc->nohw", up_ref, weight.reshape(Cout, Cin)) \
        + bias.reshape(1, Cout, 1, 1)

    assert out.shape == (N, Cout, H * scale, W * scale), out.shape
    assert jnp.allclose(out, ref, atol=1e-4, rtol=1e-4), "mismatch vs reference"

    print("KERNEL_OK")
</pallas_src>

<mosaic_0001>
module attributes {stable_mosaic.version = 11 : i64} {
  func.func @_upsample_conv1x1_kernel(%arg0: i32, %arg1: i32, %arg2: memref<1x4x128xf32, #tpu.memory_space<vmem>>, %arg3: memref<8x4xf32, #tpu.memory_space<vmem>>, %arg4: memref<8x1xf32, #tpu.memory_space<vmem>>, %arg5: memref<128x512xf32, #tpu.memory_space<vmem>>, %arg6: memref<1x8x512xf32, #tpu.memory_space<vmem>>) attributes {dimension_semantics = [#tpu.dimension_semantics<parallel>, #tpu.dimension_semantics<parallel>], iteration_bounds = array<i64: 2, 2>, scalar_prefetch = 0 : i64, scratch_operands = 0 : i64, tpu.core_type = #tpu.core_type<tc>, window_params = [{transform_indices = @transform_0, window_bounds = array<i64: 1, 4, 128>}, {pipeline_mode = #tpu.pipeline_mode<synchronous>, transform_indices = @transform_1, window_bounds = array<i64: 8, 4>}, {pipeline_mode = #tpu.pipeline_mode<synchronous>, transform_indices = @transform_2, window_bounds = array<i64: 8, 1>}, {pipeline_mode = #tpu.pipeline_mode<synchronous>, transform_indices = @transform_3, window_bounds = array<i64: 128, 512>}, {transform_indices = @transform_4, window_bounds = array<i64: 1, 8, 512>}]} {
    %c0 = arith.constant 0 : index
    %c0_0 = arith.constant 0 : index
    %c0_1 = arith.constant 0 : index
    %0 = vector.load %arg2[%c0, %c0_0, %c0_1] : memref<1x4x128xf32, #tpu.memory_space<vmem>>, vector<1x4x128xf32>
    %1 = vector.shape_cast %0 : vector<1x4x128xf32> to vector<4x128xf32>
    %c0_2 = arith.constant 0 : index
    %c0_3 = arith.constant 0 : index
    %2 = vector.load %arg3[%c0_2, %c0_3] : memref<8x4xf32, #tpu.memory_space<vmem>>, vector<8x4xf32>
    %cst = arith.constant dense<0.000000e+00> : vector<8x128xf32>
    %3 = tpu.matmul %2, %1, %cst {dimension_numbers = #tpu.dot_dimension_numbers<[1], [0], [0], [1], [0, 0, 1, 1], [], []>} : vector<8x4xf32>, vector<4x128xf32>, vector<8x128xf32> -> vector<8x128xf32>
    %c0_4 = arith.constant 0 : index
    %c0_5 = arith.constant 0 : index
    %4 = vector.load %arg4[%c0_4, %c0_5] : memref<8x1xf32, #tpu.memory_space<vmem>>, vector<8x1xf32>
    %5 = vector.broadcast %4 : vector<8x1xf32> to vector<8x128xf32>
    %6 = arith.addf %3, %5 : vector<8x128xf32>
    %c0_6 = arith.constant 0 : index
    %c0_7 = arith.constant 0 : index
    %7 = vector.load %arg5[%c0_6, %c0_7] : memref<128x512xf32, #tpu.memory_space<vmem>>, vector<128x512xf32>
    %cst_8 = arith.constant dense<0.000000e+00> : vector<8x512xf32>
    %8 = tpu.matmul %6, %7, %cst_8 {dimension_numbers = #tpu.dot_dimension_numbers<[1], [0], [0], [1], [0, 0, 1, 1], [], []>} : vector<8x128xf32>, vector<128x512xf32>, vector<8x512xf32> -> vector<8x512xf32>
    %c0_9 = arith.constant 0 : index
    %c0_10 = arith.constant 0 : index
    %c0_11 = arith.constant 0 : index
    %9 = vector.load %arg6[%c0_9, %c0_10, %c0_11] : memref<1x8x512xf32, #tpu.memory_space<vmem>>, vector<1x8x512xf32>
    %10 = vector.shape_cast %9 : vector<1x8x512xf32> to vector<8x512xf32>
    %11 = vector.shape_cast %8 : vector<8x512xf32> to vector<1x8x512xf32>
    tpu.vector_store %arg6[%c0_9, %c0_10, %c0_11], %11 {strides = array<i32>} : memref<1x8x512xf32, #tpu.memory_space<vmem>>, vector<1x8x512xf32>,
    return
  }
  func.func @transform_0(%arg0: i32, %arg1: i32) -> (i32, i32, i32) {
    %c0_i32 = arith.constant 0 : i32
    %c0_i32_0 = arith.constant 0 : i32
    return %arg0, %c0_i32, %arg1 : i32, i32, i32
  }
  func.func @transform_1(%arg0: i32, %arg1: i32) -> (i32, i32) {
    %c0_i32 = arith.constant 0 : i32
    %c0_i32_0 = arith.constant 0 : i32
    %c0_i32_1 = arith.constant 0 : i32
    return %c0_i32, %c0_i32_0 : i32, i32
  }
  func.func @transform_2(%arg0: i32, %arg1: i32) -> (i32, i32) {
    %c0_i32 = arith.constant 0 : i32
    %c0_i32_0 = arith.constant 0 : i32
    %c0_i32_1 = arith.constant 0 : i32
    return %c0_i32, %c0_i32_0 : i32, i32
  }
  func.func @transform_3(%arg0: i32, %arg1: i32) -> (i32, i32) {
    %c0_i32 = arith.constant 0 : i32
    %c0_i32_0 = arith.constant 0 : i32
    %c0_i32_1 = arith.constant 0 : i32
    return %c0_i32, %c0_i32_0 : i32, i32
  }
  func.func @transform_4(%arg0: i32, %arg1: i32) -> (i32, i32, i32) {
    %c0_i32 = arith.constant 0 : i32
    %c0_i32_0 = arith.constant 0 : i32
    return %arg0, %c0_i32, %arg1 : i32, i32, i32
  }
}

</mosaic_0001>

<bundles_post_ra>
// kernel: tpu_custom_call.1
= control target key start
LH: loop header
LB: loop body
LE: loop exit
PB: predicated region body
PF: predicated region fallthrough
CT: control target
= control target key end

     0   :  { %9 = vsyncpa [#allocation3], 0  ;;  %s1159_s0 = inlined_call_operand.vmem [shape: f32[2,4,256], index: 0, kind: input, shape index: {}]   ;;  %s1160_s1 = inlined_call_operand.vmem [shape: f32[8,4], index: 1, kind: input, shape index: {}]   ;;  %s1161_s2 = inlined_call_operand.vmem [shape: f32[8,1], index: 2, kind: input, shape index: {}]   ;;  %s1162_s3 = inlined_call_operand.hbm [shape: f32[128,512], index: 3, kind: input, shape index: {}]   ;;  %s1163_s4 = inlined_call_operand.hbm [shape: f32[2,8,1024], index: 4, kind: output, shape index: {}]  }
   0x1   :  { %10 = vsyncpa [#allocation4], 0 }
   0x2   :  { %12 = vsyncpa [#allocation4 + $0x1], 0  ;;  %s978_s15 = smov 0   ;;  %s980_s16 = smov 0  }
   0x3   :  { %s982_s17 = smov 0   ;;  %s984_s18 = smov 0  }
   0x4   :  { %s986_s19 = smov 0   ;;  %s988_s20 = smov 0  }
   0x5   :  { %s990_s21 = smov 0   ;;  %s992_s22 = smov 0  }
   0x6 LB: > { %s641_s23 = sadd.s32 4294967295, %s944_s22   ;;  %s642_s24 = sadd.s32 4294967294, %s944_s22   ;;  %s944_s22 = sphi %s992_s22, %s18_s22   ;;  %s940_s21 = sphi %s990_s21, %s1183_s21   ;;  %s936_s20 = sphi %s988_s20, %s1182_s20   ;;  %s932_s19 = sphi %s986_s19, %s1181_s19   ;;  %s928_s18 = sphi %s984_s18, %s1180_s18   ;;  %s924_s17 = sphi %s982_s17, %s1179_s17   ;;  %s920_s16 = sphi %s980_s16, %s1178_s16   ;;  %s916_s15 = sphi %s978_s15, %s1177_s15  }
   0x7   : > { %s27_s25 = sadd.s32 1, %s936_s20  ;;  %s30_s26 = sadd.s32 1, %s940_s21 }
   0x8   : > { %p28_p0 = scmp.ge.s32.totalorder %s27_s25, 2  ;;  %s130_s27 = sadd.s32 1, %s924_s17 }
   0x9   : > { %p140_p1 = scmp.ne.s32.totalorder %s924_s17, %s920_s16  ;;  %p141_p2 = scmp.eq.s32.totalorder %s641_s23, 3 }
   0xa   : > { %s1185_s25 = smov (%p28_p0, %s27_s25), 0  ;;  %s1187_s26 = smov (!%p28_p0, %s30_s26), %s940_s21 }
   0xb   : > { %s126_s28 = ssub.s32 %s936_s20, %s1185_s25  ;;  %p1030_p3 = por %p141_p2, %p140_p1 }
   0xc   : > { %p32_p4 = scmp.ge.s32.totalorder %s1187_s26, 2  ;;  %p146_p5 = scmp.ne.s32.totalorder %s920_s16, %s916_s15 }
   0xd   : > { %s1168_s29 = scalar_select %p1030_p3, 1, 0 }
   0xe   : > { %p147_p6 = scmp.eq.s32.totalorder %s642_s24, 3  ;;  %p643_p7 = scmp.ge.s32.totalorder %s944_s22, 1 }
   0xf   : > { %s1189_s26 = smov (%p32_p4, %s1187_s26), 0  ;;  %p154_p9 = scmp.lt.s32.totalorder %s944_s22, 5 }
  0x10   : > { %p1039_p8 = por %p147_p6, %p146_p5  ;;  %s125_s5 = ssub.s32 %s940_s21, %s1189_s26 }
  0x11   : > { %s127_s6 = sor.u32 %s126_s28, %s125_s5  ;;  %p1046_p10 = pnand %p643_p7, %p154_p9 }
  0x12   : > { %s1169_s30 = scalar_select %p1039_p8, 1, 0 }
  0x13   : > { %s1170_s7 = scalar_select %p1046_p10, 1, 0 }
  0x14   : > { %p128_p11 = scmp.eq.s32.totalorder %s127_s6, 0  ;;  %p1050_p12 = scmp.eq.s32.totalorder %s641_s23, 0 }
  0x15   : > { %p736_p13 = pneg %p1046_p10  ;;  %s946_s10 = smov [#allocation2]  }
  0x16   : > { %s1171_s8 = scalar_select %p1050_p12, 1, 0 }
  0x17   : > { %s1057_s9 = scalar_select %p128_p11, %s924_s17, %s130_s27  }
  0x18   : > { %s172_s11 = sshll.u32 %s946_s10, 4  ;;  %p1061_p0 = pnand %p1050_p12, %p736_p13  ;;  %s173_s11 = int_to_ptr.vmem [resolvable:$true] %s172_s11 }
  0x19   : > { %s818_s23 = scalar_lea.hbm %s1162_s3, 8192 }
  0x1a   : > { %p819_p1 = scmp.ne.s32.totalorder %s1162_s3, %s818_s23  ;;  %p820_p2 = pneg %p1061_p0 }
  0x1b   : > { %p825_p6 = scmp.lt.u32.totalorder %s818_s23, %s1162_s3 }
  0x1c   : > { %p821_p4 = pnand %p820_p2, %p819_p1 }
  0x1e   : > { %p822_p5 = pneg %p821_p4 }
  0x20   : > { %p827_p7 = pnand %p825_p6, %p822_p5 }
  0x22   : > { %830 = shalt.err (!%p827_p7)
}
  0x23   : > { %s831_s6 = scalar_lea.vmem %s173_s11, 8192  ;;  %p839_p8 = scmp.lt.s32.totalorder %s173_s11, %s173_s11 }
  0x24   : > { %p832_p9 = scmp.ne.s32.totalorder %s173_s11, %s831_s6  ;;  %p840_p3 = scmp.lt.s32.totalorder %s831_s6, %s831_s6 }
  0x26   : > { %p834_p11 = pnand %p832_p9, %p820_p2  ;;  %p841_p12 = por %p840_p3, %p839_p8 }
  0x28   : > { %p835_p13 = pneg %p834_p11 }
  0x2a   : > { %p842_p10 = pnand %p841_p12, %p835_p13 }
  0x2c   : > { %845 = shalt.err (!%p842_p10)
}
  0x2d   : > { %s947_s10 = smov 512   ;;  %s948_s13 = smov 32  }
  0x2e   : > { %739 = dma.hbm_to_vmem [thread:$0]  (!%p1061_p0), %s1162_s3, 8192, %s173_s11, [#allocation3], %s947_s10, %s947_s10, %s948_s13  }
  0x2f   : > { %p1173_p1 = scmp.ne.s32.totalorder %s1170_s7, 0 }
  0x30   : > { %p1174_p4 = scmp.ne.s32.totalorder (!%p1173_p1), %s1171_s8, 0 }
  0x31   : > { %199 = sbr.rel (%p1173_p1) target bundleno = 508 (0x1fc), region = 36 }
  0x38   : > { %907 = dma.done.wait (%p1174_p4), [#allocation3], 8192  }
  0x39   : > { %909 = vsyncadd (%p1174_p4), [#allocation3], 4294959104  ;;  %p228_p3 = scmp.lt.s32.totalorder %s932_s19, 1  ;;  %p230_p8 = scmp.lt.s32.totalorder %s928_s18, 1  ;;  %v949_v0 = vmov 0.0   ;;  %vm950_vm0 = vmmov 0  }
  0x3a   : > { %661 = vmatprep.subr.mxu0 %v949_v0  ;;  %451 = vmatprep.mubr.f32.mxu1 %v949_v0  ;;  %v951_v1 = vmov 0   ;;  %vm249_vm1 = vcmask 1043456   ;;  %v238_v2 = vld [vmem:[%s1160_s1] sm:$0xff]  ;;  %vm245_vm2 = vcmask 31744   ;;  %v324_v4 = vld [vmem:[#allocation2 + $0x8] sm:$0xff]  ;;  %v326_v7 = vld [vmem:[#allocation2 + $0x18] sm:$0xff] }
  0x3b   : > { %s229_s12 = scalar_select %p228_p3, %s932_s19, 1  ;;  %663 = vmatprep.mubr.msk.f32.mxu0 %vm950_vm0, %v949_v0  ;;  %817 = vset.pattern.permute.xlu0 %v951_v1  ;;  %v239_v3 = vld [vmem:[%s1161_s2] sm:$0xff]  ;;  %v328_v6 = vld [vmem:[#allocation2 + $0x28] sm:$0xff]  ;;  %v330_v9 = vld [vmem:[#allocation2 + $0x38] sm:$0xff] }
  0x3c   : > { %s231_s7 = scalar_select %p230_p8, %s928_s18, 1  ;;  %242 = vperm.xlu0 %817, %v239_v3   ;;  %v666_v8 = vpack.c.bf16 %v328_v6, %v324_v4  ;;  %v323_v10 = vld [vmem:[#allocation2] sm:$0xff]  ;;  %v698_v12 = vpack.c.bf16 %v330_v9, %v326_v7  ;;  %v325_v14 = vld [vmem:[#allocation2 + $0x10] sm:$0xff]  ;;  %v332_v16 = vld [vmem:[#allocation2 + $0x48] sm:$0xff] }
  0x3d   : > { %s649_s11 = sshll.u32 %s229_s12, 1  ;;  %v327_v11 = vld [vmem:[#allocation2 + $0x20] sm:$0xff]  ;;  %v329_v15 = vld [vmem:[#allocation2 + $0x30] sm:$0xff]  ;;  %v336_v18 = vld [vmem:[#allocation2 + $0x68] sm:$0xff]  ;;  %s225_s24 = sand.u32 1, %s920_s16  }
  0x3e   : > { %s233_s23 = sadd.s32 %s649_s11, %s231_s7  ;;  %v668_v13 = vpack.c.bf16 %v327_v11, %v323_v10  ;;  %667 = vmatprep.subr.bf16.mxu1 %v666_v8  ;;  %v700_v17 = vpack.c.bf16 %v329_v15, %v325_v14  ;;  %v334_v19 = vld [vmem:[#allocation2 + $0x58] sm:$0xff]  ;;  %v670_v21 = vpack.c.bf16 %v336_v18, %v332_v16  ;;  %v331_v23 = vld [vmem:[#allocation2 + $0x40] sm:$0xff]  ;;  %v333_v25 = vld [vmem:[#allocation2 + $0x50] sm:$0xff]  ;;  %s648_s12 = sshll.u32 %s225_s24, 5 }
  0x3f   : > { %s650_s28 = sshll.u32 %s233_s23, 2  ;;  %v338_v20 = vld [vmem:[#allocation2 + $0x78] sm:$0xff]  ;;  %v335_v24 = vld [vmem:[#allocation2 + $0x60] sm:$0xff]  ;;  %v337_v27 = vld [vmem:[#allocation2 + $0x70] sm:$0xff]  ;;  %s654_s7 = sshll.u32 %s928_s18, 2 }
  0x40   : > { %s235_s5 = scalar_lea.vmem %s1159_s0, %s650_s28  ;;  %669 = vmatpush1.bf16.msra.mxu1 %v668_v13  ;;  %v702_v22 = vpack.c.bf16 %v338_v20, %v334_v19  ;;  %v672_v26 = vpack.c.bf16 %v335_v24, %v331_v23  ;;  %v340_v28 = vld [vmem:[#allocation2 + $0x88] sm:$0xff]  ;;  %v704_v30 = vpack.c.bf16 %v337_v27, %v333_v25  ;;  %v342_v32 = vld [vmem:[#allocation2 + $0x98] sm:$0xff]  ;;  %v339_v34 = vld [vmem:[#allocation2 + $0x80] sm:$0xff]  ;;  %s655_s11 = sshll.u32 %s932_s19, 3 }
  0x41   : > { %v237_v5 = vld [vmem:[%s235_s5] sm:$0xf]  ;;  %v344_v29 = vld [vmem:[#allocation2 + $0xa8] sm:$0xff]  ;;  %671 = vmatprep.subr.bf16.mxu1 %v670_v21  ;;  %v346_v33 = vld [vmem:[#allocation2 + $0xb8] sm:$0xff]  ;;  %s546_s23 = sadd.s32 %s655_s11, %s654_s7  ;;  %s227_s28 = scalar_lea.vmem [#allocation5], %s648_s12 }
  0x42   : > { %662 = vmatpush3.msk.msra.mxu0 %vm249_vm1, %v237_v5  ;;  %v674_v31 = vpack.c.bf16 %v344_v29, %v340_v28  ;;  %v706_v35 = vpack.c.bf16 %v346_v33, %v342_v32  ;;  %v343_v36 = vld [vmem:[#allocation2 + $0xa0] sm:$0xff]  ;;  %v341_v37 = vld [vmem:[#allocation2 + $0x90] sm:$0xff]  ;;  %v348_v40 = vld [vmem:[#allocation2 + $0xc8] sm:$0xff]  ;;  %s550_s8 = sshll.u32 %s227_s28, 4  ;;  %s656_s27 = sshll.u32 %s546_s23, 7  ;;  %s1103_s8 = int_to_ptr.vmem [resolvable:$true] %s550_s8 }
  0x43   : > { %664 = vmatmul.mubr.msk.f32.vlgmr.msra.gmra.mrb[0].mxu0 %vm245_vm2, %v238_v2  ;;  %699 = vmatprep.subr.bf16.mxu0 %v698_v12  ;;  %v345_v38 = vld [vmem:[#allocation2 + $0xb0] sm:$0xff]  ;;  %v676_v39 = vpack.c.bf16 %v343_v36, %v339_v34  ;;  %v352_v41 = vld [vmem:[#allocation2 + $0xe8] sm:$0xff]  ;;  %v350_v42 = vld [vmem:[#allocation2 + $0xd8] sm:$0xff]  ;;  %s1108_s10 = scalar_lea.hbm %s1163_s4, %s656_s27  ;;  %s534_s18 = scalar_lea.sflag [#allocation4], %s225_s24 }
  0x44   : > { %522 = vmatprep.mubr.f32.mxu0 %v949_v0  ;;  %701 = vmatpush1.bf16.msra.mxu0 %v700_v17  ;;  %v708_v43 = vpack.c.bf16 %v345_v38, %v341_v37  ;;  %v678_v44 = vpack.c.bf16 %v352_v41, %v348_v40  ;;  %v354_v45 = vld [vmem:[#allocation2 + $0xf8] sm:$0xff]  ;;  %v347_v46 = vld [vmem:[#allocation2 + $0xc0] sm:$0xff]  ;;  %v349_v49 = vld [vmem:[#allocation2 + $0xd0] sm:$0xff]  ;;  %s846_s19 = scalar_lea.vmem %s1103_s8, 512  ;;  %p1175_p12 = scmp.ne.s32.totalorder %s1168_s29, 0 }
  0x45   : > { %703 = vmatprep.subr.bf16.mxu0 %v702_v22  ;;  %673 = vmatpush1.bf16.msra.mxu1 %v672_v26  ;;  %v351_v47 = vld [vmem:[#allocation2 + $0xe0] sm:$0xff]  ;;  %v710_v48 = vpack.c.bf16 %v354_v45, %v350_v42  ;;  %v353_v50 = vld [vmem:[#allocation2 + $0xf0] sm:$0xff]  ;;  %v356_v51 = vld [vmem:[#allocation2 + $0x108] sm:$0xff]  ;;  %p847_p10 = scmp.ne.s32.totalorder %s1103_s8, %s846_s19  ;;  %s952_s13 = smov [#allocation5]  }
  0x46   : > { %675 = vmatprep.subr.bf16.mxu1 %v674_v31  ;;  %v360_v52 = vld [vmem:[#allocation2 + $0x128] sm:$0xff]  ;;  %v358_v53 = vld [vmem:[#allocation2 + $0x118] sm:$0xff]  ;;  %v680_v55 = vpack.c.bf16 %v351_v47, %v347_v46  ;;  %v712_v56 = vpack.c.bf16 %v353_v50, %v349_v49  ;;  %v355_v58 = vld [vmem:[#allocation2 + $0x100] sm:$0xff]  ;;  %s850_s14 = sshll.u32 %s952_s13, 4  ;;  %s851_s14 = int_to_ptr.vmem [resolvable:$false] %s850_s14 }
  0x47   : > { %v362_v54 = vld [vmem:[#allocation2 + $0x138] sm:$0xff]  ;;  %v682_v57 = vpack.c.bf16 %v360_v52, %v356_v51  ;;  %v359_v59 = vld [vmem:[#allocation2 + $0x120] sm:$0xff]  ;;  %v357_v60 = vld [vmem:[#allocation2 + $0x110] sm:$0xff]  ;;  %p848_p0 = pnand %p847_p10, %p1175_p12  ;;  %s852_s12 = scalar_lea.vmem %s851_s14, 1024 }
  0x48   : > { %705 = vmatpush1.bf16.msra.mxu0 %v704_v30  ;;  %v714_v61 = vpack.c.bf16 %v362_v54, %v358_v53  ;;  %v361_v62 = vld [vmem:[#allocation2 + $0x130] sm:$0xff]  ;;  %v364_v63 = vld [vmem:[#allocation2 + $0x148] sm:$0xff]  ;;  %v366_v1 = vld [vmem:[#allocation2 + $0x158] sm:$0xff]  ;;  %v684_v3 = vpack.c.bf16 %v359_v59, %v355_v58  ;;  %p853_p5 = scmp.lt.s32.totalorder %s1103_s8, %s851_s14  ;;  %p854_p6 = scmp.lt.s32.totalorder %s852_s12, %s846_s19 }
  0x49   : > { %707 = vmatprep.subr.bf16.mxu0 %v706_v35  ;;  %677 = vmatpush1.bf16.msra.mxu1 %v676_v39  ;;  %v368_v0 = vld [vmem:[#allocation2 + $0x168] sm:$0xff]  ;;  %v370_v2 = vld [vmem:[#allocation2 + $0x178] sm:$0xff]  ;;  %v716_v4 = vpack.c.bf16 %v361_v62, %v357_v60  ;;  %v363_v6 = vld [vmem:[#allocation2 + $0x140] sm:$0xff]  ;;  %p849_p2 = pneg %p848_p0 }
  0x4a   : > { %679 = vmatprep.subr.bf16.mxu1 %v678_v44  ;;  %v686_v5 = vpack.c.bf16 %v368_v0, %v364_v63  ;;  %v367_v7 = vld [vmem:[#allocation2 + $0x160] sm:$0xff]  ;;  %v365_v8 = vld [vmem:[#allocation2 + $0x150] sm:$0xff]  ;;  %v718_v9 = vpack.c.bf16 %v370_v2, %v366_v1  ;;  %v372_v11 = vld [vmem:[#allocation2 + $0x188] sm:$0xff]  ;;  %p855_p7 = por %p854_p6, %p853_p5 }
  0x4b   : > { %v369_v10 = vld [vmem:[#allocation2 + $0x170] sm:$0xff]  ;;  %v376_v12 = vld [vmem:[#allocation2 + $0x1a8] sm:$0xff]  ;;  %v374_v13 = vld [vmem:[#allocation2 + $0x198] sm:$0xff]  ;;  %v688_v15 = vpack.c.bf16 %v367_v7, %v363_v6 }
  0x4c   : > { %709 = vmatpush1.bf16.msra.mxu0 %v708_v43  ;;  %v378_v14 = vld [vmem:[#allocation2 + $0x1b8] sm:$0xff]  ;;  %v720_v16 = vpack.c.bf16 %v369_v10, %v365_v8  ;;  %v690_v17 = vpack.c.bf16 %v376_v12, %v372_v11  ;;  %v371_v18 = vld [vmem:[#allocation2 + $0x180] sm:$0xff]  ;;  %v373_v20 = vld [vmem:[#allocation2 + $0x190] sm:$0xff]  ;;  %p856_p9 = pnand %p855_p7, %p849_p2 }
  0x4d   : > { %711 = vmatprep.subr.bf16.mxu0 %v710_v48  ;;  %681 = vmatpush1.bf16.msra.mxu1 %v680_v55  ;;  %v375_v19 = vld [vmem:[#allocation2 + $0x1a0] sm:$0xff]  ;;  %v722_v21 = vpack.c.bf16 %v378_v14, %v374_v13  ;;  %v377_v22 = vld [vmem:[#allocation2 + $0x1b0] sm:$0xff]  ;;  %v380_v23 = vld [vmem:[#allocation2 + $0x1c8] sm:$0xff] }
  0x4e   : > { %683 = vmatprep.subr.bf16.mxu1 %v682_v57  ;;  %v384_v24 = vld [vmem:[#allocation2 + $0x1e8] sm:$0xff]  ;;  %v382_v25 = vld [vmem:[#allocation2 + $0x1d8] sm:$0xff]  ;;  %v692_v27 = vpack.c.bf16 %v375_v19, %v371_v18  ;;  %v724_v28 = vpack.c.bf16 %v377_v22, %v373_v20  ;;  %v379_v30 = vld [vmem:[#allocation2 + $0x1c0] sm:$0xff] }
  0x4f   : > { %v386_v26 = vld [vmem:[#allocation2 + $0x1f8] sm:$0xff]  ;;  %v694_v29 = vpack.c.bf16 %v384_v24, %v380_v23  ;;  %v383_v31 = vld [vmem:[#allocation2 + $0x1e0] sm:$0xff]  ;;  %v381_v34 = vld [vmem:[#allocation2 + $0x1d0] sm:$0xff] }
  0x50   : > { %713 = vmatpush1.bf16.msra.mxu0 %v712_v56  ;;  %v726_v32 = vpack.c.bf16 %v386_v26, %v382_v25  ;;  %v696_v33 = vpack.c.bf16 %v383_v31, %v379_v30  ;;  %v385_v35 = vld [vmem:[#allocation2 + $0x1f0] sm:$0xff] }
  0x51   : > { %715 = vmatprep.subr.bf16.mxu0 %v714_v61  ;;  %685 = vmatpush1.bf16.msra.mxu1 %v684_v3  ;;  %v728_v36 = vpack.c.bf16 %v385_v35, %v381_v34 }
  0x52   : > { %687 = vmatprep.subr.bf16.mxu1 %v686_v5 }
  0x54   : > { %717 = vmatpush1.bf16.msra.mxu0 %v716_v4 }
  0x55   : > { %719 = vmatprep.subr.bf16.mxu0 %v718_v9  ;;  %689 = vmatpush1.bf16.msra.mxu1 %v688_v15 }
  0x56   : > { %691 = vmatprep.subr.bf16.mxu1 %v690_v17 }
  0x58   : > { %721 = vmatpush1.bf16.msra.mxu0 %v720_v16 }
  0x59   : > { %723 = vmatprep.subr.bf16.mxu0 %v722_v21  ;;  %693 = vmatpush1.bf16.msra.mxu1 %v692_v27 }
  0x5a   : > { %695 = vmatprep.subr.bf16.mxu1 %v694_v29 }
  0x5c   : > { %725 = vmatpush1.bf16.msra.mxu0 %v724_v28 }
  0x5d   : > { %727 = vmatprep.subr.bf16.mxu0 %v726_v32  ;;  %697 = vmatpush1.bf16.msra.mxu1 %v696_v33 }
  0x60   : > { %729 = vmatpush1.bf16.msra.mxu0 %v728_v36 }
  0xbb   : > { %v243_v37 = vpop.permute.xlu0 %242 }
 0x116   : > { %v319_v38 = vpop.f32.mrb[0].mxu0 }
 0x117   : > { %v320_v39 = vadd.f32 %v319_v38, %v243_v37  ;;  %v665_v40 = vpop.f32.mrb[1].mxu0 }
 0x119   : > { %452 = vmatmul.mubr.f32.vlgmr.msra.gmra.mrb[0].mxu1 %v320_v39  ;;  %523 = vmatmul.mubr.f32.vlgmr.msra.gmra.mrb[2].mxu0 %v320_v39 }
 0x1ec   : > { %v453_v41 = vpop.f32.mrb[0].mxu1  ;;  %v524_v42 = vpop.f32.mrb[2].mxu0 }
 0x1ed   : > { %529 = vst [vmem:[%s227_s28] sm:$0xff] %v453_v41  ;;  %531 = vst [vmem:[%s227_s28 + $0x10] sm:$0xff] %v524_v42  ;;  %v455_v43 = vpop.f32.mrb[1].mxu1  ;;  %v526_v44 = vpop.f32.mrb[3].mxu0 }
 0x1ee   : > { %530 = vst [vmem:[%s227_s28 + $0x8] sm:$0xff] %v455_v43  ;;  %532 = vst [vmem:[%s227_s28 + $0x18] sm:$0xff] %v526_v44 }
 0x1ef   : > { %859 = shalt.err (!%p856_p9)
}
 0x1f0   : > { %s860_s24 = scalar_lea.hbm %s1108_s10, 512  ;;  %s864_s23 = scalar_lea.hbm %s1163_s4, 2048 }
 0x1f1   : > { %p861_p11 = scmp.ne.s32.totalorder %s1108_s10, %s860_s24  ;;  %p865_p4 = scmp.lt.u32.totalorder %s1108_s10, %s1163_s4 }
 0x1f2   : > { %p866_p3 = scmp.lt.u32.totalorder %s864_s23, %s860_s24  ;;  %p868_p10 = scmp.lt.u32.totalorder %s860_s24, %s1108_s10 }
 0x1f3   : > { %p862_p13 = pnand %p861_p11, %p1175_p12 }
 0x1f4   : > { %p867_p8 = por %p866_p3, %p865_p4 }
 0x1f5   : > { %p863_p1 = pneg %p862_p13 }
 0x1f6   : > { %p869_p0 = por %p868_p10, %p867_p8 }
 0x1f8   : > { %p870_p2 = pnand %p869_p0, %p863_p1 }
 0x1fa   : > { %873 = shalt.err (!%p870_p2)
}
 0x1fb   : > { %734 = dma.vmem_to_hbm [thread:$0]  (%p1175_p12), %s1103_s8, 512, %s1108_s10, %s534_s18  }
 0x1fc PF: > { %p746_p5 = scmp.ge.s32.totalorder %s944_s22, 2  ;;  %s562_s5 = sand.u32 1, %s916_s15  }
 0x1fd   : > { %p1176_p6 = scmp.ne.s32.totalorder %s1169_s30, 0  ;;  %s563_s6 = scalar_lea.sflag [#allocation4], %s562_s5 }
 0x1ff   : > { %p741_p7 = pnand %p746_p5, %p1176_p6 }
 0x201   : > { %911 = dma.done.wait (!%p741_p7), %s563_s6, 512  }
 0x202   : > { %913 = vsyncadd (!%p741_p7), %s563_s6, 4294966784  ;;  %s18_s22 = sadd.s32 1, %s944_s22   ;;  %s1177_s15 = smov %s920_s16 }
 0x203   : > { %p15_p9 = scmp.ge.s32.totalorder %s18_s22, 6   ;;  %s1178_s16 = smov %s924_s17 }
 0x204   : > { %s1179_s17 = smov %s1057_s9  ;;  %s1180_s18 = smov %s936_s20 }
 0x205   : > { %s1181_s19 = smov %s940_s21  ;;  %s1182_s20 = smov %s1185_s25 }
 0x206   : > { %s1183_s21 = smov %s1189_s26  ;;  %17 = sbr.rel (!%p15_p9) target bundleno = 6 (0x6), region = 76 }
 0x20d   :  { %568 = vsyncpa [#allocation3], 1 }
 0x20e   :  { %570 = vsyncpa [#allocation3 + $0x1], 1 }
 0x20f   :  { %571 = vsyncpa [#allocation4], 1 }
 0x210   :  { %573 = vsyncpa [#allocation4 + $0x1], 1 }

</bundles_post_ra>
